<compile_context>
chip_gen: v5e
topology: v5e:2x2
jax: 0.10.0
libtpu: 0.0.40
codegen_flags: <defaults>
</compile_context>

<pallas_src>
import functools

import jax
import jax.numpy as jnp
from jax.experimental import pallas as pl
from jax.experimental.pallas import tpu as pltpu

_LANE = 128
_SUBLANE = 8
_TARGET_BLOCK_BYTES = 4 * 1024 * 1024   # per-step DMA target (dtype independent)
_SINGLE_BLOCK_BYTES = 1 * 1024 * 1024   # below this, one whole-array block
# 4 MiB block * 2 buffers * (in + out) = 16 MiB; 32 MiB limit leaves slack and is
# within scoped VMEM on v5e (128 MiB phys), v6e (128 MiB) and v7x (64 MiB).
_VMEM_LIMIT_BYTES = 32 * 1024 * 1024


def _act_kernel(x_ref, o_ref, *, negative_slope: float):
    x = x_ref[...]
    if negative_slope == 0.0:
        # ReLU (scalar 0 -> no explicit broadcast in the kernel body)
        o_ref[...] = jnp.maximum(x, 0)
    else:
        # LeakyReLU(slope), valid for 0 < slope < 1: max(x, slope*x)
        o_ref[...] = jnp.maximum(x, x * jnp.asarray(negative_slope, x.dtype))


def _round_up(a: int, m: int) -> int:
    return ((a + m - 1) // m) * m


def _round_down(a: int, m: int) -> int:
    return (a // m) * m


def _pick_row_block(rows: int, row_bytes: int) -> int:
    """Rows per grid step: ~_TARGET_BLOCK_BYTES per DMA, multiple of 8 sublanes,
    and >= 2 grid steps whenever there is enough work (v7x megacore)."""
    total = rows * row_bytes
    if total <= _SINGLE_BLOCK_BYTES or rows <= _SUBLANE:
        # Tiny tensor (or too few rows to split): one whole-array block.
        # block dim == full array dim is always a legal BlockSpec.
        return rows
    target = max(_SUBLANE, _round_down(_TARGET_BLOCK_BYTES // row_bytes, _SUBLANE))
    if rows > target:
        return target                      # grid >= 2 automatically
    # Whole tensor would fit in one block: split ~in half so both TCs get work.
    return max(_SUBLANE, _round_up(pl.cdiv(rows, 2), _SUBLANE))


def activation(x: jnp.ndarray, act_type: str, *, donate_input: bool = False) -> jnp.ndarray:
    """Elementwise activation matching torch nn.ReLU / nn.LeakyReLU(0.2)."""
    assert act_type in {"relu", "leaky_relu"}
    negative_slope = 0.0 if act_type == "relu" else 0.2

    orig_shape = x.shape
    dtype = x.dtype
    n = int(x.size)
    if n == 0:
        return x
    itemsize = jnp.dtype(dtype).itemsize

    # Copy-free 2-D view of the tensor:
    #  * lane-dense (rows, 128) whenever numel % 128 == 0 (typical NCHW case)
    #  * otherwise collapse leading dims onto the original last dim.
    if n % _LANE == 0:
        last = _LANE
    else:
        last = int(orig_shape[-1]) if x.ndim >= 1 and orig_shape[-1] > 0 else n
    rows = n // last
    row_bytes = last * itemsize

    row_block = _pick_row_block(rows, row_bytes)
    grid = (pl.cdiv(rows, row_block),)

    kernel = functools.partial(_act_kernel, negative_slope=negative_slope)

    out2d = pl.pallas_call(
        kernel,
        out_shape=jax.ShapeDtypeStruct((rows, last), dtype),
        grid=grid,
        in_specs=[pl.BlockSpec((row_block, last), lambda i: (i, 0))],
        out_specs=pl.BlockSpec((row_block, last), lambda i: (i, 0)),
        # Optional in-place update (mirrors inplace=True in the PyTorch module);
        # only truly aliases the caller's buffer if the caller donates it.
        input_output_aliases={0: 0} if donate_input else {},
        cost_estimate=pl.CostEstimate(
            flops=n, transcendentals=0, bytes_accessed=2 * n * itemsize),
        compiler_params=pltpu.CompilerParams(
            dimension_semantics=("parallel",),
            vmem_limit_bytes=_VMEM_LIMIT_BYTES,
        ),
    )(x.reshape(rows, last))

    return out2d.reshape(orig_shape)


def _reference(x: jnp.ndarray, act_type: str) -> jnp.ndarray:
    if act_type == "relu":
        return jnp.maximum(x, 0)
    return jnp.where(x >= 0, x, x * jnp.asarray(0.2, x.dtype))


if __name__ == "__main__":
    key = jax.random.PRNGKey(0)
    ok = True

    test_inputs = [
        # 1) Aligned small (numel % 128 == 0): single whole-array block.
        jax.random.normal(key, (2, 4, 16, 16), dtype=jnp.float32),
        # 2) Aligned large: lane-dense (rows,128), 4 MiB blocks, grid of 2.
        jax.random.normal(jax.random.PRNGKey(1), (4, 32, 128, 128), dtype=jnp.float32),
        # 3) Ragged small: (30, 7) whole-array block, no pad / no slice.
        jax.random.normal(jax.random.PRNGKey(2), (2, 3, 5, 7), dtype=jnp.float32),
        # 4) Ragged medium: split into 2 grid steps, boundary block masked.
        jax.random.normal(jax.random.PRNGKey(3), (1000, 300), dtype=jnp.float32),
        # 5) numel % 128 == 0 but % 1024 != 0: (15, 128) whole-array block.
        jax.random.normal(jax.random.PRNGKey(4), (3, 5, 128), dtype=jnp.float32),
        # 6) bf16 passthrough (half the HBM bytes on this bandwidth-bound op).
        jax.random.normal(jax.random.PRNGKey(5), (2, 4, 16, 16), dtype=jnp.bfloat16),
    ]

    for xi in test_inputs:
        for act_type in ("relu", "leaky_relu"):
            out = jax.block_until_ready(activation(xi, act_type))
            ref = _reference(xi, act_type)
            if out.shape != xi.shape or out.dtype != xi.dtype:
                ok = False
            if not jnp.allclose(out.astype(jnp.float32), ref.astype(jnp.float32),
                                atol=1e-5, rtol=1e-5):
                ok = False

    if ok:
        print("KERNEL_OK")
    else:
        print("KERNEL_MISMATCH")
</pallas_src>

<mosaic_0001>
module attributes {stable_mosaic.version = 11 : i64} {
  func.func @_act_kernel(%arg0: i32, %arg1: memref<16x128xf32, #tpu.memory_space<vmem>>, %arg2: memref<16x128xf32, #tpu.memory_space<vmem>>) attributes {dimension_semantics = [#tpu.dimension_semantics<parallel>], iteration_bounds = array<i64: 1>, scalar_prefetch = 0 : i64, scratch_operands = 0 : i64, tpu.core_type = #tpu.core_type<tc>, window_params = [{transform_indices = @transform_0, window_bounds = array<i64: 16, 128>}, {transform_indices = @transform_1, window_bounds = array<i64: 16, 128>}]} {
    %c0 = arith.constant 0 : index
    %c0_0 = arith.constant 0 : index
    %0 = vector.load %arg1[%c0, %c0_0] : memref<16x128xf32, #tpu.memory_space<vmem>>, vector<16x128xf32>
    %cst = arith.constant 0.000000e+00 : f32
    %1 = vector.broadcast %cst : f32 to vector<16x128xf32>
    %2 = arith.maximumf %0, %1 : vector<16x128xf32>
    %c0_1 = arith.constant 0 : index
    %c0_2 = arith.constant 0 : index
    %3 = vector.load %arg2[%c0_1, %c0_2] : memref<16x128xf32, #tpu.memory_space<vmem>>, vector<16x128xf32>
    tpu.vector_store %arg2[%c0_1, %c0_2], %2 {strides = array<i32>} : memref<16x128xf32, #tpu.memory_space<vmem>>, vector<16x128xf32>,
    return
  }
  func.func @transform_0(%arg0: i32) -> (i32, i32) {
    %c0_i32 = arith.constant 0 : i32
    %c0_i32_0 = arith.constant 0 : i32
    return %arg0, %c0_i32 : i32, i32
  }
  func.func @transform_1(%arg0: i32) -> (i32, i32) {
    %c0_i32 = arith.constant 0 : i32
    %c0_i32_0 = arith.constant 0 : i32
    return %arg0, %c0_i32 : i32, i32
  }
}

</mosaic_0001>

<bundles_post_ra>
// kernel: tpu_custom_call.1
= control target key start
LH: loop header
LB: loop body
LE: loop exit
PB: predicated region body
PF: predicated region fallthrough
CT: control target
= control target key end

     0   :  { %6 = vsyncpa [#allocation3], 0  ;;  %s126_s0 = inlined_call_operand.hbm [shape: f32[16,128], index: 0, kind: input, shape index: {}]   ;;  %s127_s1 = inlined_call_operand.hbm [shape: f32[16,128], index: 1, kind: output, shape index: {}]  }
   0x1   :  { %7 = vsyncpa [#allocation4], 0  ;;  %s12_s8 = sshll.u32 %s126_s0, 4  ;;  %s106_s9 = smov [#allocation2]   ;;  %s13_s8 = int_to_ptr.hbm [resolvable:$true] %s12_s8 }
   0x2   :  { %s14_s10 = sshll.u32 %s106_s9, 4  ;;  %s107_s11 = smov 128   ;;  %s15_s10 = int_to_ptr.vmem [resolvable:$true] %s14_s10 }
   0x3   :  { %s108_s12 = smov 8  }
   0x4   :  { %20 = dma.hbm_to_vmem [thread:$0]  %s13_s8, 256, %s15_s10, [#allocation3], %s107_s11, %s107_s11, %s108_s12  }
   0x5   :  { %102 = dma.done.wait [#allocation3], 256  }
   0x6   :  { %103 = vsyncadd [#allocation3], 4294967040  ;;  %s109_s13 = smov [#allocation5]   ;;  %s37_s17 = sshll.u32 %s127_s1, 4  ;;  %v25_v0 = vld [vmem:[#allocation2] sm:$0xff]  ;;  %v26_v1 = vld [vmem:[#allocation2 + $0x8] sm:$0xff]  ;;  %s38_s17 = int_to_ptr.hbm [resolvable:$true] %s37_s17 }
   0x7   :  { %s35_s14 = sshll.u32 %s109_s13, 4  ;;  %v27_v2 = vmax.f32 %v25_v0, 0.0  ;;  %v28_v3 = vmax.f32 %v26_v1, 0.0  ;;  %s36_s14 = int_to_ptr.vmem [resolvable:$true] %s35_s14 }
   0x9   :  { %29 = vst [vmem:[#allocation5] sm:$0xff] %v27_v2 }
   0xa   :  { %30 = vst [vmem:[#allocation5 + $0x8] sm:$0xff] %v28_v3 }
   0xb   :  { %43 = dma.vmem_to_hbm [thread:$0]  %s36_s14, 256, %s38_s17, [#allocation4], %s107_s11, %s107_s11, %s108_s12  }
   0xc   :  { %104 = dma.done.wait [#allocation4], 256  }
   0xd   :  { %105 = vsyncadd [#allocation4], 4294967040 }
   0xe   :  { %48 = vsyncpa [#allocation3], 1 }
   0xf   :  { %49 = vsyncpa [#allocation4], 1 }

</bundles_post_ra>
